<compile_context>
chip_gen: v5e
topology: v5e:2x2
jax: 0.10.0
libtpu: 0.0.40
codegen_flags: <defaults>
</compile_context>

<pallas_src>
import functools

import jax
import jax.numpy as jnp
from jax.experimental import pallas as pl
from jax.experimental.pallas import tpu as pltpu

LANE = 128      # lane width (last dim)
SUBLANE = 16    # bf16 sublane packing (second-to-last dim)


def _round_up(x: int, m: int) -> int:
    return ((x + m - 1) // m) * m


def _pad2(x, rows: int, cols: int):
    r, c = x.shape
    if r == rows and c == cols:
        return x
    return jnp.pad(x, ((0, rows - r), (0, cols - c)))


def _choose_row_tiling(n: int):
    """Pick (n_pad, tile_m, tile_k) for the node dimension."""
    n16 = _round_up(max(n, 1), SUBLANE)
    if n16 <= 256:
        return n16, n16, n16            # single tile -> grid (1, 1)
    n_pad = _round_up(n, 256)
    return n_pad, 256, 256              # 256-aligned for the v6e/v7x MXU


# ----------------------------------------------------------------------------
# Pallas kernel: one GCN layer, tiled over (row blocks, A_hat column blocks)
# ----------------------------------------------------------------------------
def _gcn_layer_kernel(*refs, pre_project: bool, apply_relu: bool,
                      has_mask: bool):
    if has_mask:
        h_ref, m_ref, w_ref, adj_ref, b_ref, o_ref, acc_ref = refs
    else:
        h_ref, w_ref, adj_ref, b_ref, o_ref, acc_ref = refs
        m_ref = None

    k = pl.program_id(1)

    @pl.when(k == 0)
    def _init():
        acc_ref[...] = jnp.zeros_like(acc_ref)

    h = h_ref[...]                                   # bf16 (TK, F_in_pad)
    if m_ref is not None:
        # Mask multiply in f32 (v5e VPU has no bf16 path), bf16 back to MXU.
        h = (h.astype(jnp.float32) *
             m_ref[...].astype(jnp.float32)).astype(jnp.bfloat16)
    a = adj_ref[...]                                 # bf16 (TM, TK)

    if pre_project:
        # A_hat @ (H W): project first when F_out <= F_in.
        xw = jnp.dot(h, w_ref[...], preferred_element_type=jnp.float32)
        acc_ref[...] += jnp.dot(a, xw.astype(jnp.bfloat16),
                                preferred_element_type=jnp.float32)
    else:
        # (A_hat @ H) @ W: aggregate first when F_in < F_out (layer 0).
        acc_ref[...] += jnp.dot(a, h, preferred_element_type=jnp.float32)

    @pl.when(k == pl.num_programs(1) - 1)
    def _finalize():
        acc = acc_ref[...]
        if not pre_project:
            acc = jnp.dot(acc.astype(jnp.bfloat16), w_ref[...],
                          preferred_element_type=jnp.float32)
        out = acc + b_ref[...]                       # bias only in finalize
        if apply_relu:
            out = jnp.maximum(out, 0.0)
        o_ref[...] = out.astype(o_ref.dtype)


def gcn_layer(h, w, b, adj, mask, *, pre_project, apply_relu, tm, tk,
              out_dtype):
    """One GCNConv layer as a tiled pallas_call (all arrays pre-padded)."""
    n_pad, f_in_pad = h.shape
    f_out_pad = w.shape[1]
    acc_w = f_out_pad if pre_project else f_in_pad

    kernel = functools.partial(
        _gcn_layer_kernel, pre_project=pre_project,
        apply_relu=apply_relu, has_mask=mask is not None)

    in_specs = [pl.BlockSpec((tk, f_in_pad), lambda i, k: (k, 0))]      # H
    operands = [h]
    if mask is not None:
        in_specs.append(pl.BlockSpec((tk, f_in_pad), lambda i, k: (k, 0)))
        operands.append(mask)
    in_specs += [
        pl.BlockSpec((f_in_pad, f_out_pad), lambda i, k: (0, 0)),       # W
        pl.BlockSpec((tm, tk), lambda i, k: (i, k)),                    # A_hat
        pl.BlockSpec((1, f_out_pad), lambda i, k: (0, 0)),              # bias
    ]
    operands += [w, adj, b]

    return pl.pallas_call(
        kernel,
        out_shape=jax.ShapeDtypeStruct((n_pad, f_out_pad), out_dtype),
        grid_spec=pltpu.PrefetchScalarGridSpec(
            num_scalar_prefetch=0,
            grid=(n_pad // tm, n_pad // tk),
            in_specs=in_specs,
            out_specs=pl.BlockSpec((tm, f_out_pad), lambda i, k: (i, 0)),
            scratch_shapes=[pltpu.VMEM((tm, acc_w), jnp.float32)],
        ),
        compiler_params=pltpu.CompilerParams(
            dimension_semantics=("parallel", "arbitrary")),
    )(*operands)


# ----------------------------------------------------------------------------
# DRGSTEncoder: parameter setup + forward (glue in plain JAX)
# ----------------------------------------------------------------------------
def init_drgst_params(key, feats_dim, hidden_dim, out_dim, k_hops):
    """Glorot-uniform weights, zero biases (as in PyG GCNConv)."""
    dims = [feats_dim] + [hidden_dim] * (k_hops - 1) + [out_dim]
    params = []
    for li in range(k_hops):
        f_in, f_out = dims[li], dims[li + 1]
        key, sub = jax.random.split(key)
        limit = (6.0 / (f_in + f_out)) ** 0.5
        w = jax.random.uniform(sub, (f_in, f_out), jnp.float32, -limit, limit)
        b = jnp.zeros((1, f_out), jnp.float32)
        params.append((w, b))
    return params


def normalized_adjacency(edge_index, num_nodes):
    """Dense A_hat = D^-1/2 (A + I) D^-1/2 from a [2, E] edge_index."""
    src, dst = edge_index[0], edge_index[1]
    adj = jnp.zeros((num_nodes, num_nodes), jnp.float32)
    adj = adj.at[dst, src].set(1.0)                      # message src -> dst
    adj = adj + jnp.eye(num_nodes, dtype=jnp.float32)    # add self loops
    deg = adj.sum(axis=1)
    d_inv_sqrt = jnp.where(deg > 0, 1.0 / jnp.sqrt(deg), 0.0)
    return d_inv_sqrt[:, None] * adj * d_inv_sqrt[None, :]


def drgst_encoder_forward(params, adj_norm, features, *, dropout_p=0.5,
                          training=False, rng_key=None):
    """Mirrors DRGSTEncoder.forward: dropout -> GCNConv -> ReLU (not last)."""
    n, feats = features.shape
    out_dim = params[-1][0].shape[1]
    n_pad, tm, tk = _choose_row_tiling(n)

    adj_pad = _pad2(adj_norm.astype(jnp.float32), n_pad, n_pad).astype(
        jnp.bfloat16)
    h = _pad2(features.astype(jnp.float32), n_pad,
              _round_up(feats, LANE)).astype(jnp.bfloat16)

    if training and dropout_p > 0.0 and rng_key is None:
        rng_key = jax.random.PRNGKey(0)

    k_hops = len(params)
    for i, (w, b) in enumerate(params):
        f_in, f_out = w.shape
        f_in_pad = _round_up(f_in, LANE)
        f_out_pad = _round_up(f_out, LANE)
        w_pad = _pad2(w, f_in_pad, f_out_pad).astype(jnp.bfloat16)
        b_pad = _pad2(b.reshape(1, -1), 1, f_out_pad).astype(jnp.float32)

        mask = None
        if training and dropout_p > 0.0:
            rng_key, sub = jax.random.split(rng_key)
            keep = jax.random.bernoulli(sub, 1.0 - dropout_p,
                                        (n_pad, f_in_pad))
            mask = (keep.astype(jnp.float32) *
                    (1.0 / (1.0 - dropout_p))).astype(jnp.bfloat16)

        last = (i == k_hops - 1)
        h = gcn_layer(
            h, w_pad, b_pad, adj_pad, mask,
            pre_project=(f_out <= f_in),
            apply_relu=not last,
            tm=tm, tk=tk,
            out_dtype=jnp.float32 if last else jnp.bfloat16)

    return h[:n, :out_dim]


# Pure-JAX f32 reference (eval mode, dropout = identity).
def drgst_reference(params, adj_norm, features):
    k_hops = len(params)
    h = features.astype(jnp.float32)
    for i, (w, b) in enumerate(params):
        h = adj_norm @ (h @ w) + b
        if i != k_hops - 1:
            h = jnp.maximum(h, 0.0)
    return h


if __name__ == "__main__":
    # Small deterministic problem: 16 nodes, feats=8, hidden=32, out=16, k_hops=3.
    N, FEATS, HIDDEN, OUT, K_HOPS = 16, 8, 32, 16, 3

    key = jax.random.PRNGKey(0)
    key, kf = jax.random.split(key)
    features = jax.random.normal(kf, (N, FEATS), jnp.float32)

    # Deterministic bidirectional ring graph, [2, E] edge_index.
    src = jnp.arange(N, dtype=jnp.int32)
    dst = (src + 1) % N
    edge_index = jnp.concatenate(
        [jnp.stack([src, dst]), jnp.stack([dst, src])], axis=1)

    adj_norm = normalized_adjacency(edge_index, N)
    params = init_drgst_params(key, FEATS, HIDDEN, OUT, K_HOPS)

    # Eval mode (dropout identity): check against the pure-JAX f32 reference.
    out_eval = drgst_encoder_forward(params, adj_norm, features,
                                     dropout_p=0.5, training=False)
    jax.block_until_ready(out_eval)
    ref = drgst_reference(params, adj_norm, features)
    assert out_eval.shape == (N, OUT)
    # bf16 MXU operands -> looser tolerance than a pure-f32 pipeline.
    assert jnp.allclose(out_eval, ref, atol=5e-2, rtol=5e-2), (
        "mismatch vs reference, max abs err = "
        f"{float(jnp.max(jnp.abs(out_eval - ref)))}")

    # Training mode: exercise the fused dropout-mask path once.
    out_train = drgst_encoder_forward(params, adj_norm, features,
                                      dropout_p=0.5, training=True,
                                      rng_key=jax.random.PRNGKey(123))
    jax.block_until_ready(out_train)
    assert out_train.shape == (N, OUT)
    assert bool(jnp.all(jnp.isfinite(out_train)))

    print("KERNEL_OK")
</pallas_src>

<mosaic_0001>
module attributes {stable_mosaic.version = 11 : i64} {
  func.func @_gcn_layer_kernel(%arg0: i32, %arg1: i32, %arg2: memref<16x128xbf16, #tpu.memory_space<vmem>>, %arg3: memref<128x128xbf16, #tpu.memory_space<vmem>>, %arg4: memref<16x16xbf16, #tpu.memory_space<vmem>>, %arg5: memref<1x128xf32, #tpu.memory_space<vmem>>, %arg6: memref<16x128xbf16, #tpu.memory_space<vmem>>, %arg7: memref<16x128xf32, #tpu.memory_space<vmem>>) attributes {dimension_semantics = [#tpu.dimension_semantics<parallel>, #tpu.dimension_semantics<arbitrary>], iteration_bounds = array<i64: 1, 1>, scalar_prefetch = 0 : i64, scratch_operands = 1 : i64, tpu.core_type = #tpu.core_type<tc>, window_params = [{transform_indices = @transform_0, window_bounds = array<i64: 16, 128>}, {pipeline_mode = #tpu.pipeline_mode<synchronous>, transform_indices = @transform_1, window_bounds = array<i64: 128, 128>}, {transform_indices = @transform_2, window_bounds = array<i64: 16, 16>}, {pipeline_mode = #tpu.pipeline_mode<synchronous>, transform_indices = @transform_3, window_bounds = array<i64: 1, 128>}, {transform_indices = @transform_4, window_bounds = array<i64: 16, 128>}]} {
    %c0_i32 = arith.constant 0 : i32
    %0 = arith.cmpi eq, %arg1, %c0_i32 : i32
    %1 = arith.extui %0 : i1 to i32
    %c0_i32_0 = arith.constant 0 : i32
    %2 = arith.cmpi ne, %1, %c0_i32_0 : i32
    scf.if %2 {
      %cst_10 = arith.constant 0.000000e+00 : f32
      %12 = vector.broadcast %cst_10 : f32 to vector<16x128xf32>
      %c0_11 = arith.constant 0 : index
      %c0_12 = arith.constant 0 : index
      %13 = vector.load %arg7[%c0_11, %c0_12] : memref<16x128xf32, #tpu.memory_space<vmem>>, vector<16x128xf32>
      tpu.vector_store %arg7[%c0_11, %c0_12], %12 {strides = array<i32>} : memref<16x128xf32, #tpu.memory_space<vmem>>, vector<16x128xf32>,
    } else {
    }
    %c0 = arith.constant 0 : index
    %c0_1 = arith.constant 0 : index
    %3 = vector.load %arg2[%c0, %c0_1] : memref<16x128xbf16, #tpu.memory_space<vmem>>, vector<16x128xbf16>
    %c0_2 = arith.constant 0 : index
    %c0_3 = arith.constant 0 : index
    %4 = vector.load %arg4[%c0_2, %c0_3] : memref<16x16xbf16, #tpu.memory_space<vmem>>, vector<16x16xbf16>
    %c0_4 = arith.constant 0 : index
    %c0_5 = arith.constant 0 : index
    %5 = vector.load %arg7[%c0_4, %c0_5] : memref<16x128xf32, #tpu.memory_space<vmem>>, vector<16x128xf32>
    %cst = arith.constant dense<0.000000e+00> : vector<16x128xf32>
    %6 = tpu.matmul %4, %3, %cst {dimension_numbers = #tpu.dot_dimension_numbers<[1], [0], [0], [1], [0, 0, 1, 1], [], []>} : vector<16x16xbf16>, vector<16x128xbf16>, vector<16x128xf32> -> vector<16x128xf32>
    %7 = arith.addf %5, %6 : vector<16x128xf32>
    %c0_6 = arith.constant 0 : index
    %c0_7 = arith.constant 0 : index
    %8 = vector.load %arg7[%c0_6, %c0_7] : memref<16x128xf32, #tpu.memory_space<vmem>>, vector<16x128xf32>
    tpu.vector_store %arg7[%c0_6, %c0_7], %7 {strides = array<i32>} : memref<16x128xf32, #tpu.memory_space<vmem>>, vector<16x128xf32>,
    %c0_i32_8 = arith.constant 0 : i32
    %9 = arith.cmpi eq, %arg1, %c0_i32_8 : i32
    %10 = arith.extui %9 : i1 to i32
    %c0_i32_9 = arith.constant 0 : i32
    %11 = arith.cmpi ne, %10, %c0_i32_9 : i32
    scf.if %11 {
      %c0_10 = arith.constant 0 : index
      %c0_11 = arith.constant 0 : index
      %12 = vector.load %arg7[%c0_10, %c0_11] : memref<16x128xf32, #tpu.memory_space<vmem>>, vector<16x128xf32>
      %13 = arith.truncf %12 : vector<16x128xf32> to vector<16x128xbf16>
      %c0_12 = arith.constant 0 : index
      %c0_13 = arith.constant 0 : index
      %14 = vector.load %arg3[%c0_12, %c0_13] : memref<128x128xbf16, #tpu.memory_space<vmem>>, vector<128x128xbf16>
      %cst_14 = arith.constant dense<0.000000e+00> : vector<16x128xf32>
      %15 = tpu.matmul %13, %14, %cst_14 {dimension_numbers = #tpu.dot_dimension_numbers<[1], [0], [0], [1], [0, 0, 1, 1], [], []>} : vector<16x128xbf16>, vector<128x128xbf16>, vector<16x128xf32> -> vector<16x128xf32>
      %c0_15 = arith.constant 0 : index
      %c0_16 = arith.constant 0 : index
      %16 = vector.load %arg5[%c0_15, %c0_16] : memref<1x128xf32, #tpu.memory_space<vmem>>, vector<1x128xf32>
      %17 = vector.broadcast %16 : vector<1x128xf32> to vector<16x128xf32>
      %18 = arith.addf %15, %17 : vector<16x128xf32>
      %cst_17 = arith.constant 0.000000e+00 : f32
      %19 = vector.broadcast %cst_17 : f32 to vector<16x128xf32>
      %20 = arith.maximumf %18, %19 : vector<16x128xf32>
      %21 = arith.truncf %20 : vector<16x128xf32> to vector<16x128xbf16>
      %c0_18 = arith.constant 0 : index
      %c0_19 = arith.constant 0 : index
      %22 = vector.load %arg6[%c0_18, %c0_19] : memref<16x128xbf16, #tpu.memory_space<vmem>>, vector<16x128xbf16>
      tpu.vector_store %arg6[%c0_18, %c0_19], %21 {strides = array<i32>} : memref<16x128xbf16, #tpu.memory_space<vmem>>, vector<16x128xbf16>,
    } else {
    }
    return
  }
  func.func @transform_0(%arg0: i32, %arg1: i32) -> (i32, i32) {
    %c0_i32 = arith.constant 0 : i32
    %c0_i32_0 = arith.constant 0 : i32
    return %arg1, %c0_i32 : i32, i32
  }
  func.func @transform_1(%arg0: i32, %arg1: i32) -> (i32, i32) {
    %c0_i32 = arith.constant 0 : i32
    %c0_i32_0 = arith.constant 0 : i32
    %c0_i32_1 = arith.constant 0 : i32
    return %c0_i32, %c0_i32_0 : i32, i32
  }
  func.func @transform_2(%arg0: i32, %arg1: i32) -> (i32, i32) {
    %c0_i32 = arith.constant 0 : i32
    return %arg0, %arg1 : i32, i32
  }
  func.func @transform_3(%arg0: i32, %arg1: i32) -> (i32, i32) {
    %c0_i32 = arith.constant 0 : i32
    %c0_i32_0 = arith.constant 0 : i32
    %c0_i32_1 = arith.constant 0 : i32
    return %c0_i32, %c0_i32_0 : i32, i32
  }
  func.func @transform_4(%arg0: i32, %arg1: i32) -> (i32, i32) {
    %c0_i32 = arith.constant 0 : i32
    %c0_i32_0 = arith.constant 0 : i32
    return %arg0, %c0_i32 : i32, i32
  }
}

</mosaic_0001>

<bundles_post_ra>
// kernel: tpu_custom_call.1
= control target key start
LH: loop header
LB: loop body
LE: loop exit
PB: predicated region body
PF: predicated region fallthrough
CT: control target
= control target key end

     0   :  { %9 = vsyncpa [#allocation4], 0  ;;  %s448_s0 = inlined_call_operand.hbm [shape: bf16[16,128], index: 0, kind: input, shape index: {}]   ;;  %s449_s1 = inlined_call_operand.hbm [shape: bf16[128,128], index: 1, kind: input, shape index: {}]   ;;  %s450_s2 = inlined_call_operand.hbm [shape: bf16[16,16], index: 2, kind: input, shape index: {}]   ;;  %s451_s3 = inlined_call_operand.vmem [shape: f32[1,128], index: 3, kind: input, shape index: {}]   ;;  %s452_s4 = inlined_call_operand.hbm [shape: bf16[16,128], index: 4, kind: output, shape index: {}]  }
   0x1   :  { %10 = vsyncpa [#allocation7], 0 }
   0x2   :  { %11 = vsyncpa [#allocation5], 0  ;;  %s29_s17 = sshll.u32 %s449_s1, 4  ;;  %s390_s18 = smov [#allocation6]   ;;  %s30_s17 = int_to_ptr.hbm [resolvable:$true] %s29_s17 }
   0x3   :  { %s31_s19 = sshll.u32 %s390_s18, 4  ;;  %s16_s22 = sshll.u32 %s448_s0, 4  ;;  %s32_s19 = int_to_ptr.vmem [resolvable:$true] %s31_s19  ;;  %s17_s22 = int_to_ptr.hbm [resolvable:$true] %s16_s22 }
   0x4   :  { %s391_s23 = smov 64   ;;  %s392_s24 = smov 4  }
   0x5   :  { %37 = dma.hbm_to_vmem [thread:$0]  %s30_s17, 1024, %s32_s19, [#allocation7], %s391_s23, %s391_s23, %s392_s24  }
   0x6   :  { %s393_s25 = smov [#allocation3]   ;;  %s42_s1 = sshll.u32 %s450_s2, 4  ;;  %s43_s1 = int_to_ptr.hbm [resolvable:$true] %s42_s1 }
   0x7   :  { %s18_s26 = sshll.u32 %s393_s25, 4  ;;  %s394_s0 = smov [#allocation8]   ;;  %s19_s26 = int_to_ptr.vmem [resolvable:$true] %s18_s26 }
   0x8   :  { %24 = dma.hbm_to_vmem [thread:$0]  %s17_s22, 128, %s19_s26, [#allocation4], %s391_s23, %s391_s23, %s392_s24  }
   0x9   :  { %s44_s29 = sshll.u32 %s394_s0, 4  ;;  %s45_s29 = int_to_ptr.vmem [resolvable:$true] %s44_s29 }
   0xa   :  { %50 = dma.hbm_to_vmem [thread:$0]  %s43_s1, 128, %s45_s29, [#allocation7], %s391_s23, %s391_s23, %s392_s24  }
   0xb   :  { %384 = dma.done.wait [#allocation4], 128  }
   0xc   :  { %385 = vsyncadd [#allocation4], 4294967168 }
   0xd   :  { %386 = dma.done.wait [#allocation7], 1152  }
   0xe   :  { %387 = vsyncadd [#allocation7], 4294966144  ;;  %v266_v0 = vld [vmem:[#allocation3] sm:$0xff]  ;;  %v267_v2 = vld [vmem:[#allocation8] sm:$0xff]  ;;  %vm89_vm0 = vcmask 130048   ;;  %s395_s5 = smov [#allocation9]  }
   0xf   :  { %v275_v1 = vld [vmem:[#allocation6 + $0x38] sm:$0xff]  ;;  %100 = vmatpush.bf16.msra.mxu0 %v266_v0  ;;  %v274_v3 = vld [vmem:[#allocation6 + $0x30] sm:$0xff]  ;;  %v273_v4 = vld [vmem:[#allocation6 + $0x28] sm:$0xff]  ;;  %s209_s6 = sshll.u32 %s395_s5, 4  ;;  %s211_s9 = sshll.u32 %s452_s4, 4  ;;  %s210_s6 = int_to_ptr.vmem [resolvable:$true] %s209_s6  ;;  %s212_s9 = int_to_ptr.hbm [resolvable:$true] %s211_s9 }
  0x10   :  { %185 = vmatpush.bf16.msra.mxu1 %v275_v1  ;;  %v272_v5 = vld [vmem:[#allocation6 + $0x20] sm:$0xff]  ;;  %v271_v6 = vld [vmem:[#allocation6 + $0x18] sm:$0xff]  ;;  %v270_v7 = vld [vmem:[#allocation6 + $0x10] sm:$0xff] }
  0x11   :  { %v269_v8 = vld [vmem:[#allocation6 + $0x8] sm:$0xff]  ;;  %v268_v9 = vld [vmem:[#allocation6] sm:$0xff]  ;;  %v287_v14 = vld [vmem:[%s451_s3] ss:$0 sm:$0xff] }
  0x12   :  { %233 = vmatmul.msk.bf16.vlgmr.msra.gmra.mxu0 %vm89_vm0, %v267_v2 }
  0x14   :  { %186 = vmatpush.bf16.msra.mxu1 %v274_v3 }
  0x18   :  { %187 = vmatpush.bf16.msra.mxu1 %v273_v4 }
  0x1c   :  { %188 = vmatpush.bf16.msra.mxu1 %v272_v5 }
  0x20   :  { %189 = vmatpush.bf16.msra.mxu1 %v271_v6 }
  0x24   :  { %190 = vmatpush.bf16.msra.mxu1 %v270_v7 }
  0x28   :  { %191 = vmatpush.bf16.msra.mxu1 %v269_v8 }
  0x2c   :  { %192 = vmatpush.bf16.msra.mxu1 %v268_v9 }
  0x8f   :  { %v102_v10 = vpop.f32.mrf.mxu0 }
  0x97   :  { %v104_v11 = vpop.f32.mrf.mxu0 }
  0x98   :  { %v116_v12 = vpack.c.bf16 %v104_v11, %v102_v10 }
  0x9a   :  { %193 = vmatmul.bf16.vlgmr.msra.gmra.mxu1 %v116_v12 }
 0x117   :  { %v194_v13 = vpop.f32.mrf.mxu1 }
 0x118   :  { %v195_v15 = vadd.f32 %v287_v14, %v194_v13 }
 0x11a   :  { %v199_v18 = vmax.f32 %v195_v15, 0.0 }
 0x11f   :  { %v196_v16 = vpop.f32.mrf.mxu1 }
 0x120   :  { %v197_v17 = vadd.f32 %v287_v14, %v196_v16 }
 0x122   :  { %v200_v19 = vmax.f32 %v197_v17, 0.0 }
 0x124   :  { %v279_v20 = vpack.c.bf16 %v200_v19, %v199_v18 }
 0x126   :  { %280 = vst [vmem:[#allocation9] sm:$0xff] %v279_v20  }
 0x127   :  { %217 = dma.vmem_to_hbm [thread:$0]  %s210_s6, 128, %s212_s9, [#allocation5], %s391_s23, %s391_s23, %s392_s24  }
 0x128   :  { %388 = dma.done.wait [#allocation5], 128  }
 0x129   :  { %389 = vsyncadd [#allocation5], 4294967168 }
 0x12a   :  { %222 = vsyncpa [#allocation4], 1 }
 0x12b   :  { %223 = vsyncpa [#allocation7], 1 }
 0x12c   :  { %224 = vsyncpa [#allocation5], 1 }

</bundles_post_ra>
